<compile_context>
chip_gen: v7x
topology: tpu7x:2x2x1
jax: 0.10.0
libtpu: 0.0.40
codegen_flags: <defaults>
</compile_context>

<pallas_src>
import jax
import jax.numpy as jnp
from jax.experimental import pallas as pl
from jax.experimental.pallas import tpu as pltpu


def _mlp_kernel(x_ref, w1_ref, b1_ref, w2_ref, b2_ref, w3_ref, b3_ref, o_ref):
    # x_ref: [2, TB]   (batch on lanes)
    # w1_ref: [16, 2], b1_ref: [16, 1]
    # w2_ref: [16, 16], b2_ref: [16, 1]
    # w3_ref: [16, 1],  b3_ref: [1, 1]
    # o_ref: [1, TB]
    x = x_ref[...]

    # Layer 1: Linear(2, 16) + ReLU on the MXU (K=2 is nearly free in the
    # vector-extended slot; keeps the VPU out of the matmul path).
    h1 = jnp.dot(w1_ref[...], x,
                 preferred_element_type=jnp.float32,
                 precision=jax.lax.Precision.HIGHEST) + b1_ref[...]
    h1 = jnp.maximum(h1, 0.0)

    # Layer 2: Linear(16, 16) + ReLU on the MXU — replaces the VALU-bound
    # 16-term broadcast-FMA chain.  [16,16] x [16,TB]: K already on sublanes,
    # batch on lanes, so no transpose needed.
    h2 = jnp.dot(w2_ref[...], h1,
                 preferred_element_type=jnp.float32,
                 precision=jax.lax.Precision.HIGHEST) + b2_ref[...]
    h2 = jnp.maximum(h2, 0.0)

    # Layer 3: Linear(16, 1) as elementwise scale + sublane (XLU) reduction
    # -> [1, TB].  Only ~16 VPU ops/row remain; XLU reduce is off the VALU path.
    z = jnp.sum(h2 * w3_ref[...], axis=0, keepdims=True) + b3_ref[...]

    # Sigmoid: exp on the EUP + exact reciprocal (approx=True's ~2^-12 error
    # would risk the 1e-5 tolerance vs the f32 reference).
    o_ref[...] = pl.reciprocal(1.0 + jnp.exp(-z), approx=False)


def _round_up(n, m):
    return ((n + m - 1) // m) * m


def _choose_tiling(batch, block_b, min_steps):
    """Pick (tile, padded_batch): tiles are multiples of 128 lanes, per-tile
    padding waste stays < 128 lanes, and large batches keep >= min_steps grid
    steps so v7x's two TensorCores both get work (no effect on 1-TC v5e/v6e)."""
    b128 = _round_up(batch, 128)
    n_full128 = b128 // 128
    n_steps = max(-(-b128 // block_b), min(min_steps, n_full128))
    tb = _round_up(-(-b128 // n_steps), 128)
    n_steps = -(-b128 // tb)
    return tb, n_steps * tb


def frontline_nn(x, params, *, block_b=16384, min_steps=4):
    """FrontlineNN forward pass. x: [B, 2] float32 -> [B, 1] float32."""
    w1, b1, w2, b2, w3, b3 = params
    B = x.shape[0]

    tb, b_pad = _choose_tiling(B, block_b, min_steps)

    # Batch goes on the lane axis.  (Latency-critical callers can provide data
    # already laid out as [2, B] upstream to skip these two HBM copies; they do
    # not affect throughput — the kernel is compute-bound.)
    xt = x.T                                             # [2, B]
    if b_pad > B:
        xt = jnp.pad(xt, ((0, 0), (0, b_pad - B)))       # zero-padded lanes

    const = lambda i: (0, 0)                             # weights resident across tiles
    cost = pl.CostEstimate(
        flops=608 * B,            # ~304 MACs per row
        transcendentals=B,        # one exp per row
        bytes_accessed=12 * B,    # 8 B in + 4 B out per row
    )

    out_t = pl.pallas_call(
        _mlp_kernel,
        out_shape=jax.ShapeDtypeStruct((1, b_pad), jnp.float32),
        grid=(b_pad // tb,),
        in_specs=[
            pl.BlockSpec((2, tb), lambda i: (0, i)),     # x^T tile, streamed
            pl.BlockSpec(w1.shape, const),
            pl.BlockSpec(b1.shape, const),
            pl.BlockSpec(w2.shape, const),
            pl.BlockSpec(b2.shape, const),
            pl.BlockSpec(w3.shape, const),
            pl.BlockSpec(b3.shape, const),
        ],
        out_specs=pl.BlockSpec((1, tb), lambda i: (0, i)),   # lane-dense output tile
        compiler_params=pltpu.CompilerParams(
            dimension_semantics=("parallel",),           # megacore split on v7x
            vmem_limit_bytes=32 * 1024 * 1024,           # headroom over v5e's 16 MiB default
        ),
        cost_estimate=cost,
    )(xt, w1, b1, w2, b2, w3, b3)

    return out_t[:, :B].T                                # [B, 1]


def init_params(key):
    """Deterministic init matching the PyTorch module's shapes.

    Weights kept in PyTorch layout [out, in]; biases as [out, 1] columns;
    w3 stored as a [16, 1] column (transpose of PyTorch's [1, 16])."""
    ks = jax.random.split(key, 6)

    def linear(kw, kb, fan_in, fan_out):
        bound = 1.0 / jnp.sqrt(float(fan_in))
        w = jax.random.uniform(kw, (fan_out, fan_in), jnp.float32, -bound, bound)
        b = jax.random.uniform(kb, (fan_out, 1), jnp.float32, -bound, bound)
        return w, b

    w1, b1 = linear(ks[0], ks[1], 2, 16)
    w2, b2 = linear(ks[2], ks[3], 16, 16)
    w3, b3 = linear(ks[4], ks[5], 16, 1)
    return (w1, b1, w2, b2, w3.T, b3)   # w3 -> [16, 1]


def frontline_nn_ref(x, params):
    """Pure-JAX reference of the forward pass."""
    w1, b1, w2, b2, w3, b3 = params
    h1 = jnp.maximum(x @ w1.T + b1.T, 0.0)
    h2 = jnp.maximum(h1 @ w2.T + b2.T, 0.0)
    return jax.nn.sigmoid(h2 @ w3 + b3.T)


if __name__ == "__main__":
    key = jax.random.PRNGKey(0)
    k_x, k_x2, k_p = jax.random.split(key, 3)
    params = init_params(k_p)

    # Small batch (single 128-lane tile, grid of 1).
    B = 8
    x = jax.random.normal(k_x, (B, 2), jnp.float32)
    out = jax.block_until_ready(frontline_nn(x, params))
    ref = frontline_nn_ref(x, params)
    assert out.shape == (B, 1)
    assert jnp.allclose(out, ref, atol=1e-5, rtol=1e-5), "mismatch vs reference (B=8)"

    # Non-multiple batch to exercise the adaptive multi-tile path (grid of 3).
    B2 = 300
    x2 = jax.random.normal(k_x2, (B2, 2), jnp.float32)
    out2 = jax.block_until_ready(frontline_nn(x2, params))
    ref2 = frontline_nn_ref(x2, params)
    assert out2.shape == (B2, 1)
    assert jnp.allclose(out2, ref2, atol=1e-5, rtol=1e-5), "mismatch vs reference (B=300)"

    print("KERNEL_OK")
</pallas_src>

<mosaic_0001>
module attributes {stable_mosaic.version = 11 : i64} {
  func.func @_mlp_kernel(%arg0: i32, %arg1: memref<2x128xf32, #tpu.memory_space<vmem>>, %arg2: memref<16x2xf32, #tpu.memory_space<vmem>>, %arg3: memref<16x1xf32, #tpu.memory_space<vmem>>, %arg4: memref<16x16xf32, #tpu.memory_space<vmem>>, %arg5: memref<16x1xf32, #tpu.memory_space<vmem>>, %arg6: memref<16x1xf32, #tpu.memory_space<vmem>>, %arg7: memref<1x1xf32, #tpu.memory_space<vmem>>, %arg8: memref<1x128xf32, #tpu.memory_space<vmem>>) attributes {dimension_semantics = [#tpu.dimension_semantics<parallel>], iteration_bounds = array<i64: 1>, scalar_prefetch = 0 : i64, scratch_operands = 0 : i64, tpu.core_type = #tpu.core_type<tc>, window_params = [{transform_indices = @transform_0, window_bounds = array<i64: 2, 128>}, {pipeline_mode = #tpu.pipeline_mode<synchronous>, transform_indices = @transform_1, window_bounds = array<i64: 16, 2>}, {pipeline_mode = #tpu.pipeline_mode<synchronous>, transform_indices = @transform_2, window_bounds = array<i64: 16, 1>}, {pipeline_mode = #tpu.pipeline_mode<synchronous>, transform_indices = @transform_3, window_bounds = array<i64: 16, 16>}, {pipeline_mode = #tpu.pipeline_mode<synchronous>, transform_indices = @transform_4, window_bounds = array<i64: 16, 1>}, {pipeline_mode = #tpu.pipeline_mode<synchronous>, transform_indices = @transform_5, window_bounds = array<i64: 16, 1>}, {pipeline_mode = #tpu.pipeline_mode<synchronous>, transform_indices = @transform_6, window_bounds = array<i64: 1, 1>}, {transform_indices = @transform_7, window_bounds = array<i64: 1, 128>}]} {
    %c0 = arith.constant 0 : index
    %c0_0 = arith.constant 0 : index
    %0 = vector.load %arg1[%c0, %c0_0] : memref<2x128xf32, #tpu.memory_space<vmem>>, vector<2x128xf32>
    %c0_1 = arith.constant 0 : index
    %c0_2 = arith.constant 0 : index
    %1 = vector.load %arg2[%c0_1, %c0_2] : memref<16x2xf32, #tpu.memory_space<vmem>>, vector<16x2xf32>
    %cst = arith.constant dense<0.000000e+00> : vector<16x128xf32>
    %2 = tpu.matmul %1, %0, %cst {dimension_numbers = #tpu.dot_dimension_numbers<[1], [0], [0], [1], [0, 0, 1, 1], [], []>, precision = #tpu.contract_precision<fp32>} : vector<16x2xf32>, vector<2x128xf32>, vector<16x128xf32> -> vector<16x128xf32>
    %c0_3 = arith.constant 0 : index
    %c0_4 = arith.constant 0 : index
    %3 = vector.load %arg3[%c0_3, %c0_4] : memref<16x1xf32, #tpu.memory_space<vmem>>, vector<16x1xf32>
    %4 = vector.broadcast %3 : vector<16x1xf32> to vector<16x128xf32>
    %5 = arith.addf %2, %4 : vector<16x128xf32>
    %cst_5 = arith.constant 0.000000e+00 : f32
    %6 = vector.broadcast %cst_5 : f32 to vector<16x128xf32>
    %7 = arith.maximumf %5, %6 : vector<16x128xf32>
    %c0_6 = arith.constant 0 : index
    %c0_7 = arith.constant 0 : index
    %8 = vector.load %arg4[%c0_6, %c0_7] : memref<16x16xf32, #tpu.memory_space<vmem>>, vector<16x16xf32>
    %cst_8 = arith.constant dense<0.000000e+00> : vector<16x128xf32>
    %9 = tpu.matmul %8, %7, %cst_8 {dimension_numbers = #tpu.dot_dimension_numbers<[1], [0], [0], [1], [0, 0, 1, 1], [], []>, precision = #tpu.contract_precision<fp32>} : vector<16x16xf32>, vector<16x128xf32>, vector<16x128xf32> -> vector<16x128xf32>
    %c0_9 = arith.constant 0 : index
    %c0_10 = arith.constant 0 : index
    %10 = vector.load %arg5[%c0_9, %c0_10] : memref<16x1xf32, #tpu.memory_space<vmem>>, vector<16x1xf32>
    %11 = vector.broadcast %10 : vector<16x1xf32> to vector<16x128xf32>
    %12 = arith.addf %9, %11 : vector<16x128xf32>
    %cst_11 = arith.constant 0.000000e+00 : f32
    %13 = vector.broadcast %cst_11 : f32 to vector<16x128xf32>
    %14 = arith.maximumf %12, %13 : vector<16x128xf32>
    %c0_12 = arith.constant 0 : index
    %c0_13 = arith.constant 0 : index
    %15 = vector.load %arg6[%c0_12, %c0_13] : memref<16x1xf32, #tpu.memory_space<vmem>>, vector<16x1xf32>
    %16 = vector.broadcast %15 : vector<16x1xf32> to vector<16x128xf32>
    %17 = arith.mulf %14, %16 : vector<16x128xf32>
    %cst_14 = arith.constant dense<0.000000e+00> : vector<128xf32>
    %18 = vector.multi_reduction <add>, %17, %cst_14 [0] : vector<16x128xf32> to vector<128xf32>
    %19 = vector.shape_cast %18 : vector<128xf32> to vector<1x128xf32>
    %c0_15 = arith.constant 0 : index
    %c0_16 = arith.constant 0 : index
    %20 = vector.load %arg7[%c0_15, %c0_16] : memref<1x1xf32, #tpu.memory_space<vmem>>, vector<1x1xf32>
    %21 = vector.broadcast %20 : vector<1x1xf32> to vector<1x128xf32>
    %22 = arith.addf %19, %21 : vector<1x128xf32>
    %cst_17 = arith.constant 0.000000e+00 : f32
    %23 = vector.broadcast %cst_17 : f32 to vector<1x128xf32>
    %24 = arith.subf %23, %22 : vector<1x128xf32>
    %25 = math.exp %24 : vector<1x128xf32>
    %cst_18 = arith.constant 1.000000e+00 : f32
    %26 = vector.broadcast %cst_18 : f32 to vector<1x128xf32>
    %27 = arith.addf %26, %25 : vector<1x128xf32>
    %28 = tpu.reciprocal %27 : vector<1x128xf32> -> vector<1x128xf32>
    %c0_19 = arith.constant 0 : index
    %c0_20 = arith.constant 0 : index
    %29 = vector.load %arg8[%c0_19, %c0_20] : memref<1x128xf32, #tpu.memory_space<vmem>>, vector<1x128xf32>
    tpu.vector_store %arg8[%c0_19, %c0_20], %28 {strides = array<i32>} : memref<1x128xf32, #tpu.memory_space<vmem>>, vector<1x128xf32>,
    return
  }
  func.func @transform_0(%arg0: i32) -> (i32, i32) {
    %c0_i32 = arith.constant 0 : i32
    %c0_i32_0 = arith.constant 0 : i32
    return %c0_i32, %arg0 : i32, i32
  }
  func.func @transform_1(%arg0: i32) -> (i32, i32) {
    %c0_i32 = arith.constant 0 : i32
    %c0_i32_0 = arith.constant 0 : i32
    %c0_i32_1 = arith.constant 0 : i32
    return %c0_i32, %c0_i32_0 : i32, i32
  }
  func.func @transform_2(%arg0: i32) -> (i32, i32) {
    %c0_i32 = arith.constant 0 : i32
    %c0_i32_0 = arith.constant 0 : i32
    %c0_i32_1 = arith.constant 0 : i32
    return %c0_i32, %c0_i32_0 : i32, i32
  }
  func.func @transform_3(%arg0: i32) -> (i32, i32) {
    %c0_i32 = arith.constant 0 : i32
    %c0_i32_0 = arith.constant 0 : i32
    %c0_i32_1 = arith.constant 0 : i32
    return %c0_i32, %c0_i32_0 : i32, i32
  }
  func.func @transform_4(%arg0: i32) -> (i32, i32) {
    %c0_i32 = arith.constant 0 : i32
    %c0_i32_0 = arith.constant 0 : i32
    %c0_i32_1 = arith.constant 0 : i32
    return %c0_i32, %c0_i32_0 : i32, i32
  }
  func.func @transform_5(%arg0: i32) -> (i32, i32) {
    %c0_i32 = arith.constant 0 : i32
    %c0_i32_0 = arith.constant 0 : i32
    %c0_i32_1 = arith.constant 0 : i32
    return %c0_i32, %c0_i32_0 : i32, i32
  }
  func.func @transform_6(%arg0: i32) -> (i32, i32) {
    %c0_i32 = arith.constant 0 : i32
    %c0_i32_0 = arith.constant 0 : i32
    %c0_i32_1 = arith.constant 0 : i32
    return %c0_i32, %c0_i32_0 : i32, i32
  }
  func.func @transform_7(%arg0: i32) -> (i32, i32) {
    %c0_i32 = arith.constant 0 : i32
    %c0_i32_0 = arith.constant 0 : i32
    return %c0_i32, %arg0 : i32, i32
  }
}

</mosaic_0001>

<bundles_post_ra>
// kernel: tpu_custom_call.1
= control target key start
LH: loop header
LB: loop body
LE: loop exit
PB: predicated region body
PF: predicated region fallthrough
CT: control target
= control target key end

     0   :  { %s1407_s0 = inlined_call_operand.vmem [shape: f32[2,128], index: 0, kind: input, shape index: {}]   ;;  %s1408_s1 = inlined_call_operand.vmem [shape: f32[16,2], index: 1, kind: input, shape index: {}]   ;;  %s1409_s2 = inlined_call_operand.vmem [shape: f32[16,1], index: 2, kind: input, shape index: {}]   ;;  %s1410_s3 = inlined_call_operand.vmem [shape: f32[16,16], index: 3, kind: input, shape index: {}]   ;;  %s1411_s4 = inlined_call_operand.vmem [shape: f32[16,1], index: 4, kind: input, shape index: {}]   ;;  %s1412_s5 = inlined_call_operand.vmem [shape: f32[16,1], index: 5, kind: input, shape index: {}]   ;;  %s1413_s6 = inlined_call_operand.<no memory space> [shape: f32[1,1], index: 6, kind: input, shape index: {}]   ;;  %s1414_s7 = inlined_call_operand.hbm [shape: f32[1,128], index: 7, kind: output, shape index: {}]  }
   0x1   :  { %v12_v0 = vstv %s1413_s6 }
   0x2   :  { %13 = vst [vmem:[#allocation2] sm:$0x1] %v12_v0 }
   0x3   :  { %v29_v1 = vld [vmem:[%s1407_s0] sm:$0x3]  ;;  %vm51_vm0 = vcmask 1041408   ;;  %v31_v3 = vld [vmem:[%s1408_s1 + $0x8] sm:$0xff]  ;;  %vm44_vm1 = vcmask 15360   ;;  %v1317_v11 = vmov 0  }
   0x4   :  { %v30_v2 = vld [vmem:[%s1408_s1] sm:$0xff]  ;;  %v53_v4 = vsel %vm51_vm0, %v29_v1, 0  ;;  %v49_v6 = vsel %vm44_vm1, %v31_v3, 0  ;;  %1287 = vset.pattern.permute.xlu0 %v1317_v11  ;;  %1288 = vset.pattern.permute.xlu1 %v1317_v11 }
   0x5   :  { %v46_v5 = vsel %vm44_vm1, %v30_v2, 0  ;;  %v32_v7 = vld [vmem:[%s1409_s2] sm:$0xff]  ;;  %v56_v8 = vand.u32 4294901760, %v53_v4  ;;  %v131_v10 = vand.u32 4294901760, %v49_v6 }
   0x6   :  { %v121_v9 = vand.u32 4294901760, %v46_v5  ;;  %36 = vperm.xlu0 %1287, %v32_v7  }
   0x7   :  { %14 = vsyncpa [#allocation4], 0  ;;  %1165 = vmatprep.subr.mxu0 %v56_v8  ;;  %v132_v13 = vsub.f32 %v49_v6, %v131_v10  ;;  %v143_v14 = vsub.f32 %v53_v4, %v56_v8  ;;  %v33_v15 = vld [vmem:[%s1409_s2 + $0x8] sm:$0xff]  ;;  %v1071_v22 = vld [vmem:[%s1412_s5] sm:$0xff]  ;;  %vm560_vm2 = vcmask 130048  }
   0x8   :  { %v122_v12 = vsub.f32 %v46_v5, %v121_v9  ;;  %1166 = vmatpush3.msra.mxu0 %v56_v8  ;;  %v546_v27 = vld [vmem:[%s1410_s3] sm:$0xff]  ;;  %v549_v35 = vld [vmem:[%s1411_s4 + $0x8] sm:$0xff] }
   0x9   :  { %v133_v17 = vand.u32 4294901760, %v132_v13  ;;  %v144_v18 = vand.u32 4294901760, %v143_v14  ;;  %v1092_v26 = vld [vmem:[#allocation2] sm:$0x1]  ;;  %v562_v28 = vsel %vm560_vm2, %v546_v27, 0  ;;  %v1072_v36 = vld [vmem:[%s1412_s5 + $0x8] sm:$0xff] }
   0xa   :  { %v123_v16 = vand.u32 4294901760, %v122_v12  ;;  %41 = vperm.xlu0 %1287, %v33_v15   ;;  %v634_v29 = vand.u32 4294901760, %v562_v28  ;;  %v548_v34 = vld [vmem:[%s1411_s4] sm:$0xff]  ;;  %v547_v37 = vld [vmem:[%s1410_s3 + $0x8] sm:$0xff]  ;;  %s1318_s3 = smov [#allocation3]  }
   0xb   :  { %v134_v20 = vsub.f32 %v132_v13, %v133_v17  ;;  %v145_v21 = vsub.f32 %v143_v14, %v144_v18  ;;  %552 = vperm.xlu1 %1288, %v548_v34   ;;  %v565_v38 = vsel %vm560_vm2, %v547_v37, 0  ;;  %s1115_s4 = sshll.u32 %s1318_s3, 4  ;;  %s1116_s4 = int_to_ptr.vmem [resolvable:$true] %s1115_s4 }
   0xc   :  { %v124_v19 = vsub.f32 %v122_v12, %v123_v16  ;;  %v635_v30 = vsub.f32 %v562_v28, %v634_v29  ;;  %v644_v40 = vand.u32 4294901760, %v565_v38  ;;  %s1293_s5 = scalar_lea.vmem %s1116_s4, 16  ;;  %s1297_s21 = scalar_lea.vmem %s1116_s4, 32 }
   0xd   :  { %v135_v24 = vand.u32 4294901760, %v134_v20  ;;  %v146_v25 = vand.u32 4294901760, %v145_v21  ;;  %p1294_p0 = scmp.ne.s32.totalorder %s1116_s4, %s1293_s5  ;;  %p1298_p1 = scmp.lt.s32.totalorder %s1116_s4, %s1116_s4 }
   0xe   :  { %v125_v23 = vand.u32 4294901760, %v124_v19  ;;  %1075 = vperm.xlu0 %1287, %v1071_v22   ;;  %v636_v31 = vand.u32 4294901760, %v635_v30  ;;  %v645_v41 = vsub.f32 %v565_v38, %v644_v40  ;;  %p1299_p2 = scmp.lt.s32.totalorder %s1297_s21, %s1293_s5 }
   0xf   :  { %1170 = vmatprep.subr.mxu0 %v146_v25  ;;  %557 = vperm.xlu1 %1288, %v549_v35  }
  0x10   :  { %1167 = vmatprep.mubr.f32.mxu0 %v125_v23  ;;  %v637_v32 = vsub.f32 %v635_v30, %v636_v31  ;;  %v646_v47 = vand.u32 4294901760, %v645_v41  ;;  %p1300_p3 = por %p1299_p2, %p1298_p1 }
  0x11   :  { %1168 = vmatmul.mubr.f32.vlgmr.msra.gmra.mrb[0].mxu0 %v135_v24 }
  0x12   :  { %1171 = vmatpush3.msra.mxu0 %v146_v25  ;;  %1172 = vmatprep.mubr.f32.mxu0 %v121_v9  ;;  %v638_v33 = vand.u32 4294901760, %v637_v32  ;;  %v647_v52 = vsub.f32 %v645_v41, %v646_v47  ;;  %p1301_p4 = pnand %p1300_p3, %p1294_p0 }
  0x13   :  { %1175 = vmatprep.subr.mxu0 %v143_v14  ;;  %1095 = vperm.xlu0 %1287, %v1092_v26  }
  0x14   :  { %1199 = vmatprep.mubr.f32.mxu1 %v638_v33  ;;  %1080 = vperm.xlu1 %1288, %v1072_v36   ;;  %v648_v58 = vand.u32 4294901760, %v647_v52 }
  0x19   :  { %1173 = vmatmul.mubr.f32.vlgmr.msra.gmra.mrb[0].mxu0 %v131_v10 }
  0x1a   :  { %1176 = vmatpush3.msra.mxu0 %v143_v14  ;;  %1177 = vmatprep.mubr.f32.mxu0 %v122_v12  ;;  %v1098_v14 = vlaneseq }
  0x1b   :  { %1180 = vmatprep.subr.mxu0 %v56_v8 }
  0x21   :  { %1178 = vmatmul.mubr.f32.vlgmr.msra.gmra.mrb[0].mxu0 %v132_v13 }
  0x22   :  { %1181 = vmatpush3.msra.mxu0 %v56_v8  ;;  %1182 = vmatprep.mubr.f32.mxu0 %v123_v16 }
  0x23   :  { %1185 = vmatprep.subr.mxu0 %v144_v18 }
  0x29   :  { %1183 = vmatmul.mubr.f32.vlgmr.msra.gmra.mrb[0].mxu0 %v133_v17  ;;  %v1099_v17 = vshrl.u32 %v1098_v14, 7 }
  0x2a   :  { %1186 = vmatpush3.msra.mxu0 %v144_v18  ;;  %1187 = vmatprep.mubr.f32.mxu0 %v121_v9 }
  0x2b   :  { %1190 = vmatprep.subr.mxu0 %v56_v8  ;;  %v1100_v20 = vsub.s32 0, %v1099_v17 }
  0x31   :  { %1188 = vmatmul.mubr.f32.vlgmr.msra.gmra.mrb[0].mxu0 %v131_v10 }
  0x32   :  { %1191 = vmatpush3.msra.mxu0 %v56_v8  ;;  %1192 = vmatprep.mubr.f32.mxu0 %v121_v9 }
  0x39   :  { %1193 = vmatmul.mubr.f32.vlgmr.msra.gmra.mrb[0].mxu0 %v131_v10 }
  0x85   :  { %v37_v39 = vpop.permute.xlu0 %36 }
  0x89   :  { %v42_v42 = vpop.permute.xlu0 %41 }
  0x8a   :  { %v553_v2 = vpop.permute.xlu1 %552 }
  0x8d   :  { %v1076_v11 = vpop.permute.xlu0 %1075 }
  0x8e   :  { %v558_v3 = vpop.permute.xlu1 %557 }
  0x92   :  { %v1096_v22 = vpop.permute.xlu0 %1095 }
  0x93   :  { %v1081_v10 = vpop.permute.xlu1 %1080  ;;  %v1101_v24 = vrot.slane %v1096_v22, %v1100_v20 }
 0x10c   :  { %v1194_v43 = vpop.f32.mrb[0].mxu0 }
 0x10d   :  { %v1261_v44 = vadd.f32 %v1194_v43, %v42_v42  ;;  %v534_v45 = vpop.f32.mrb[1].mxu0 }
 0x10e   :  { %v1262_v46 = vadd.f32 %v534_v45, %v37_v39 }
 0x10f   :  { %v545_v48 = vmax.f32 %v1261_v44, 0.0 }
 0x110   :  { %v544_v49 = vmax.f32 %v1262_v46, 0.0 }
 0x111   :  { %v571_v50 = vand.u32 4294901760, %v545_v48 }
 0x112   :  { %v568_v51 = vand.u32 4294901760, %v544_v49 }
 0x113   :  { %v663_v53 = vsub.f32 %v545_v48, %v571_v50 }
 0x114   :  { %v1237_v54 = vpack.c.bf16 %v571_v50, %v568_v51  ;;  %v656_v55 = vsub.f32 %v544_v49, %v568_v51 }
 0x115   :  { %v664_v56 = vand.u32 4294901760, %v663_v53 }
 0x116   :  { %v657_v57 = vand.u32 4294901760, %v656_v55  ;;  %1238 = vmatprep.subr.bf16.mxu1 %v1237_v54  ;;  %v1245_v59 = vpack.c.bf16 %v663_v53, %v656_v55 }
 0x117   :  { %1240 = vmatpush3.bf16.msra.mxu1 %v1237_v54  ;;  %v665_v60 = vsub.f32 %v663_v53, %v664_v56 }
 0x118   :  { %v658_v61 = vsub.f32 %v656_v55, %v657_v57  ;;  %v1253_v62 = vpack.c.bf16 %v664_v56, %v657_v57 }
 0x119   :  { %v666_v63 = vand.u32 4294901760, %v665_v60 }
 0x11a   :  { %1200 = vmatmul.mubr.f32.vlgmr.msra.gmra.mrb[0].mxu1 %v648_v58  ;;  %v659_v0 = vand.u32 4294901760, %v658_v61 }
 0x11b   :  { %1206 = vmatprep.mubr.f32.mxu1 %v634_v29 }
 0x11c   :  { %v1241_v1 = vpack.c.bf16 %v666_v63, %v659_v0 }
 0x11e   :  { %1242 = vmatprep.subr.bf16.mxu1 %v1241_v1 }
 0x11f   :  { %1244 = vmatpush3.bf16.msra.mxu1 %v1241_v1 }
 0x120   :  { %1246 = vmatprep.subr.bf16.mxu1 %v1245_v59 }
 0x122   :  { %1207 = vmatmul.mubr.f32.vlgmr.msra.gmra.mrb[0].mxu1 %v644_v40 }
 0x123   :  { %1248 = vmatpush3.bf16.msra.mxu1 %v1245_v59  ;;  %1213 = vmatprep.mubr.f32.mxu1 %v635_v30 }
 0x124   :  { %1250 = vmatprep.subr.bf16.mxu1 %v1237_v54 }
 0x12a   :  { %1214 = vmatmul.mubr.f32.vlgmr.msra.gmra.mrb[0].mxu1 %v645_v41 }
 0x12b   :  { %1252 = vmatpush3.bf16.msra.mxu1 %v1237_v54  ;;  %1220 = vmatprep.mubr.f32.mxu1 %v636_v31 }
 0x12c   :  { %1254 = vmatprep.subr.bf16.mxu1 %v1253_v62 }
 0x132   :  { %1221 = vmatmul.mubr.f32.vlgmr.msra.gmra.mrb[0].mxu1 %v646_v47 }
 0x133   :  { %1256 = vmatpush3.bf16.msra.mxu1 %v1253_v62  ;;  %1227 = vmatprep.mubr.f32.mxu1 %v634_v29 }
 0x134   :  { %1258 = vmatprep.subr.bf16.mxu1 %v1237_v54 }
 0x13a   :  { %1228 = vmatmul.mubr.f32.vlgmr.msra.gmra.mrb[0].mxu1 %v644_v40 }
 0x13b   :  { %1260 = vmatpush3.bf16.msra.mxu1 %v1237_v54  ;;  %1234 = vmatprep.mubr.f32.mxu1 %v634_v29 }
 0x142   :  { %1235 = vmatmul.mubr.f32.vlgmr.msra.gmra.mrb[0].mxu1 %v644_v40 }
 0x215   :  { %v1236_v4 = vpop.f32.mrb[0].mxu1 }
 0x216   :  { %v1263_v5 = vadd.f32 %v1236_v4, %v558_v3  ;;  %v1059_v6 = vpop.f32.mrb[1].mxu1 }
 0x217   :  { %v1264_v7 = vadd.f32 %v1059_v6, %v553_v2 }
 0x218   :  { %v1070_v8 = vmax.f32 %v1263_v5, 0.0 }
 0x219   :  { %v1069_v9 = vmax.f32 %v1264_v7, 0.0 }
 0x21a   :  { %v1084_v12 = vmul.f32 %v1081_v10, %v1070_v8 }
 0x21b   :  { %v1083_v13 = vmul.f32 %v1076_v11, %v1069_v9 }
 0x21d   :  { %v1085_v15 = vadd.f32 %v1084_v12, %v1083_v13 }
 0x21f   :  { %v1086_v16 = vrot.slane %v1085_v15, 4 }
 0x221   :  { %v1087_v18 = vadd.f32 %v1086_v16, %v1085_v15 }
 0x223   :  { %v1088_v19 = vrot.slane %v1087_v18, 2 }
 0x225   :  { %v1089_v21 = vadd.f32 %v1088_v19, %v1087_v18 }
 0x227   :  { %v1090_v23 = vrot.slane %v1089_v21, 1 }
 0x229   :  { %v1091_v25 = vadd.f32 %v1090_v23, %v1089_v21 }
 0x22b   :  { %v1102_v26 = vadd.f32 %v1101_v24, %v1091_v25 }
 0x22d   :  { %v1103_v27 = vsub.f32 0.0, %v1102_v26 }
 0x22f   :  { %v1104_v28 = vmul.f32 1.442695, %v1103_v27 }
 0x231   :  { %1289 = vpow2.f32 %v1104_v28 }
 0x23b   :  { %v1290_v29 = vpop.eup %1289 }
 0x23c   :  { %v1106_v30 = vadd.f32 1.0, %v1290_v29 }
 0x23e   :  { %1291 = vrcp.f32 %v1106_v30 }
 0x248   :  { %v1292_v31 = vpop.eup %1291 }
 0x249   :  { %1108 = vst [vmem:[#allocation3] sm:$0x1] %v1292_v31 }
 0x24a   :  { %1304 = shalt.err (!%p1301_p4)
}
 0x24b   :  { %s1305_s24 = scalar_lea.hbm %s1414_s7, 16 }
 0x24c   :  { %p1306_p5 = scmp.ne.s32.totalorder %s1414_s7, %s1305_s24  ;;  %p1309_p6 = scmp.lt.u32.totalorder %s1305_s24, %s1414_s7 }
 0x24e   :  { %p1311_p7 = pnand %p1309_p6, %p1306_p5 }
 0x250   :  { %1314 = shalt.err (!%p1311_p7)
}
 0x251   :  { %1118 = dma.vmem_to_hbm [thread:$0]  %s1116_s4, 16, %s1414_s7, [#allocation4]  }
 0x252   :  { %1315 = dma.done.wait [#allocation4], 16  }
 0x253   :  { %1316 = vsyncadd [#allocation4], 4294967280 }
 0x254   :  { %1122 = vsyncpa [#allocation4], 1 }

</bundles_post_ra>
